<compile_context>
chip_gen: v5e
topology: v5e:2x2
jax: 0.10.0
libtpu: 0.0.40
codegen_flags: <defaults>
</compile_context>

<pallas_src>
import functools
import math

import jax
import jax.numpy as jnp
from jax.experimental import pallas as pl
from jax.experimental.pallas import tpu as pltpu


def _patch_embed_kernel(x_ref, w_ref, pos_ref, o_ref):
    # x_ref:   (tile_rows, ph*W)   bf16, rows = (batch, h_patch)
    # w_ref:   (ph*W, wp*E)        bf16, block-diagonal expanded linear weight
    # pos_ref: (tile_rows, wp*E)   f32, positional bias (linear bias folded in)
    # o_ref:   (tile_rows, wp*E)   f32, lane-dense output slab
    y = jnp.dot(x_ref[...], w_ref[...], preferred_element_type=jnp.float32)
    o_ref[...] = (y + pos_ref[...]).astype(o_ref.dtype)


def _device_hints():
    """(num_tensorcores, vmem budget bytes, target M rows) for the local TPU."""
    try:
        kind = jax.devices()[0].device_kind.lower()
    except Exception:  # pragma: no cover
        kind = ""
    if "v7" in kind:
        # 2 TensorCores/chip, 64 MiB VMEM per core (32 MiB scoped default).
        return 2, 48 << 20, 256
    # v5e / v6e: single TensorCore, 128 MiB physical VMEM -> few, big steps.
    return 1, 96 << 20, 1024


def _pick_tile_rows(total_rows, h_patches, bytes_per_row, *,
                    target_rows, num_tc, vmem_budget):
    """Rows (M) per grid step.

    Multiple of lcm(h_patches, 8) so (a) the pre-tiled positional block lines
    up with every M-tile and (b) the block's sublane dim stays 8-aligned.
    Capped by the per-generation VMEM budget; on 2-TensorCore chips (v7x) the
    grid is forced to >= num_tc steps once there is enough work per core to
    amortize the ~0.35 us/step overhead.
    """
    unit = (h_patches * 8) // math.gcd(h_patches, 8)          # lcm(hp, 8)
    padded_min = pl.cdiv(total_rows, unit) * unit
    max_rows = max(unit, vmem_budget // max(bytes_per_row, 1))
    cap = max(unit, (min(target_rows, max_rows) // unit) * unit)
    tile = min(padded_min, cap)
    if num_tc > 1:
        per_core = pl.cdiv(pl.cdiv(padded_min, unit), num_tc) * unit
        if per_core >= 64:                                     # enough work to split
            tile = min(tile, per_core)
    padded_rows = pl.cdiv(total_rows, tile) * tile
    return tile, padded_rows


def make_patch_embedder(weight, bias, pos_bias, *, image_height, image_width,
                        patch_height, patch_width, batch):
    """One-time (module-init) parameter preprocessing; returns a jitted forward.

    weight:   (E, ph*pw)  nn.Linear weight (out_features, in_features)
    bias:     (E,)        nn.Linear bias
    pos_bias: (P, E)      patch_positional_bias, P = (H/ph)*(W/pw)
    forward:  (B, 1, H, W) f32 -> (B, P, E) f32
    """
    H, W = image_height, image_width
    ph, pw = patch_height, patch_width
    hp, wp = H // ph, W // pw
    P, E = hp * wp, weight.shape[0]
    k_big = ph * W                      # contraction width (= ph*wp*pw)
    n_out = wp * E                      # lane-dense output width
    total_rows = batch * hp

    num_tc, vmem_budget, target_rows = _device_hints()
    # Per-row VMEM cost: double-buffered bf16 x block + f32 out block, plus the
    # (single-buffered) f32 positional tile.
    bytes_per_row = 2 * (k_big * 2) + 2 * (n_out * 4) + (n_out * 4)
    tile_rows, padded_rows = _pick_tile_rows(
        total_rows, hp, bytes_per_row,
        target_rows=target_rows, num_tc=num_tc, vmem_budget=vmem_budget)
    grid = (padded_rows // tile_rows,)

    # ---- parameter-side preprocessing (once, a few KB) -----------------------
    # w_big[(phr, wj, pwc), (v, e)] = weight[e, phr*pw + pwc] * (wj == v)
    wt = weight.reshape(E, ph, pw)
    w_big = jnp.einsum("erc,wv->rwcve", wt, jnp.eye(wp, dtype=weight.dtype))
    w_big = w_big.reshape(k_big, n_out).astype(jnp.bfloat16)     # MXU input dtype
    # Linear bias folded into the positional bias; pre-tiled to a full M-tile so
    # the kernel epilogue is one full-vreg VPU add (no in-kernel concat/relayout).
    pos2 = (pos_bias + bias[None, :]).astype(jnp.float32).reshape(hp, n_out)
    pos_tile = jnp.tile(pos2, (tile_rows // hp, 1))

    vmem_needed = (2 * tile_rows * (k_big * 2 + n_out * 4)        # x + out (dbl buf)
                   + 2 * (k_big * n_out * 2 + tile_rows * n_out * 4))
    vmem_limit = int(min(vmem_budget, max(2 * vmem_needed, 32 << 20)))

    def build(single_buffer_params):
        param_kw = {}
        if single_buffer_params and hasattr(pl, "Buffered"):
            # Grid-invariant operands are fetched once -> no double buffer.
            param_kw = dict(pipeline_mode=pl.Buffered(1))

        call = pl.pallas_call(
            _patch_embed_kernel,
            out_shape=jax.ShapeDtypeStruct((padded_rows, n_out), jnp.float32),
            grid_spec=pltpu.PrefetchScalarGridSpec(
                num_scalar_prefetch=0,
                grid=grid,
                in_specs=[
                    pl.BlockSpec((tile_rows, k_big), lambda g: (g, 0)),
                    pl.BlockSpec((k_big, n_out), lambda g: (0, 0), **param_kw),
                    pl.BlockSpec((tile_rows, n_out), lambda g: (0, 0), **param_kw),
                ],
                out_specs=pl.BlockSpec((tile_rows, n_out), lambda g: (g, 0)),
            ),
            compiler_params=pltpu.CompilerParams(
                dimension_semantics=("parallel",),
                vmem_limit_bytes=vmem_limit,
            ),
        )

        @jax.jit
        def forward(image):
            # Free row-major reshape: fuses patchify into the GEMM's M/K layout.
            # x2[b*hp + hi, phr*W + wj*pw + pwc] == image[b, 0, hi*ph+phr, wj*pw+pwc]
            x2 = image.reshape(total_rows, k_big).astype(jnp.bfloat16)
            if padded_rows != total_rows:
                x2 = jnp.pad(x2, ((0, padded_rows - total_rows), (0, 0)))
            out2 = call(x2, w_big, pos_tile)
            # Free reshape back: rows (b, hi), cols (wj, e) -> (B, hi*wp+wj, e).
            return out2[:total_rows].reshape(batch, P, E)

        return forward

    forward = build(True)
    try:
        # Probe-compile once at init (also warms the jit cache for real calls);
        # fall back to default double-buffering if Buffered(1) is unsupported.
        jax.block_until_ready(forward(jnp.zeros((batch, 1, H, W), jnp.float32)))
    except Exception:  # pragma: no cover - older JAX without Buffered(1)
        forward = build(False)
    return forward


if __name__ == "__main__":
    # Module config (small shapes): 16x16 image, 4x4 patches, embedding dim 32.
    image_height = image_width = 16
    patch_height = patch_width = 4
    embedding_dimension = 32
    batch = 2

    vertical_patches = image_height // patch_height
    horizontal_patches = image_width // patch_width
    total_patches = vertical_patches * horizontal_patches          # 16
    patch_dim = patch_height * patch_width                         # 16

    key = jax.random.PRNGKey(0)
    k_img, k_w, k_b, k_pos = jax.random.split(key, 4)

    image = jax.random.normal(
        k_img, (batch, 1, image_height, image_width), dtype=jnp.float32)

    # nn.Linear-style uniform init; pos bias nonzero to exercise the add.
    bound = 1.0 / (patch_dim ** 0.5)
    weight = jax.random.uniform(k_w, (embedding_dimension, patch_dim),
                                minval=-bound, maxval=bound, dtype=jnp.float32)
    bias = jax.random.uniform(k_b, (embedding_dimension,),
                              minval=-bound, maxval=bound, dtype=jnp.float32)
    pos_bias = 0.02 * jax.random.normal(
        k_pos, (total_patches, embedding_dimension), dtype=jnp.float32)

    # Init-time parameter prep + compiled forward (cached across calls).
    forward = make_patch_embedder(
        weight, bias, pos_bias,
        image_height=image_height, image_width=image_width,
        patch_height=patch_height, patch_width=patch_width, batch=batch)

    out = jax.block_until_ready(forward(image))

    # Pure-JAX f32 reference (straightforward einops-equivalent patchify + linear).
    hp = image_height // patch_height
    wp = image_width // patch_width
    xr = image.reshape(batch, hp, patch_height, wp, patch_width)
    xr = jnp.transpose(xr, (0, 1, 3, 2, 4)).reshape(batch, total_patches, patch_dim)
    ref = xr @ weight.T + bias + pos_bias

    assert out.shape == (batch, total_patches, embedding_dimension)
    # bf16 MXU inputs with f32 accumulation: loosened tolerance vs the f32 ref.
    assert jnp.allclose(out, ref, atol=5e-2, rtol=5e-2), \
        float(jnp.max(jnp.abs(out - ref)))

    print("KERNEL_OK")
</pallas_src>

<mosaic_0001>
module attributes {stable_mosaic.version = 11 : i64} {
  func.func @_patch_embed_kernel(%arg0: i32, %arg1: memref<8x64xbf16, #tpu.memory_space<vmem>>, %arg2: memref<64x128xbf16, #tpu.memory_space<vmem>>, %arg3: memref<8x128xf32, #tpu.memory_space<vmem>>, %arg4: memref<8x128xf32, #tpu.memory_space<vmem>>) attributes {dimension_semantics = [#tpu.dimension_semantics<parallel>], iteration_bounds = array<i64: 1>, scalar_prefetch = 0 : i64, scratch_operands = 0 : i64, tpu.core_type = #tpu.core_type<tc>, window_params = [{transform_indices = @transform_0, window_bounds = array<i64: 8, 64>}, {pipeline_mode = #tpu.pipeline_mode<synchronous>, transform_indices = @transform_1, window_bounds = array<i64: 64, 128>}, {pipeline_mode = #tpu.pipeline_mode<synchronous>, transform_indices = @transform_2, window_bounds = array<i64: 8, 128>}, {transform_indices = @transform_3, window_bounds = array<i64: 8, 128>}]} {
    %c0 = arith.constant 0 : index
    %c0_0 = arith.constant 0 : index
    %0 = vector.load %arg1[%c0, %c0_0] : memref<8x64xbf16, #tpu.memory_space<vmem>>, vector<8x64xbf16>
    %c0_1 = arith.constant 0 : index
    %c0_2 = arith.constant 0 : index
    %1 = vector.load %arg2[%c0_1, %c0_2] : memref<64x128xbf16, #tpu.memory_space<vmem>>, vector<64x128xbf16>
    %cst = arith.constant dense<0.000000e+00> : vector<8x128xf32>
    %2 = tpu.matmul %0, %1, %cst {dimension_numbers = #tpu.dot_dimension_numbers<[1], [0], [0], [1], [0, 0, 1, 1], [], []>} : vector<8x64xbf16>, vector<64x128xbf16>, vector<8x128xf32> -> vector<8x128xf32>
    %c0_3 = arith.constant 0 : index
    %c0_4 = arith.constant 0 : index
    %3 = vector.load %arg3[%c0_3, %c0_4] : memref<8x128xf32, #tpu.memory_space<vmem>>, vector<8x128xf32>
    %4 = arith.addf %2, %3 : vector<8x128xf32>
    %c0_5 = arith.constant 0 : index
    %c0_6 = arith.constant 0 : index
    %5 = vector.load %arg4[%c0_5, %c0_6] : memref<8x128xf32, #tpu.memory_space<vmem>>, vector<8x128xf32>
    tpu.vector_store %arg4[%c0_5, %c0_6], %4 {strides = array<i32>} : memref<8x128xf32, #tpu.memory_space<vmem>>, vector<8x128xf32>,
    return
  }
  func.func @transform_0(%arg0: i32) -> (i32, i32) {
    %c0_i32 = arith.constant 0 : i32
    %c0_i32_0 = arith.constant 0 : i32
    return %arg0, %c0_i32 : i32, i32
  }
  func.func @transform_1(%arg0: i32) -> (i32, i32) {
    %c0_i32 = arith.constant 0 : i32
    %c0_i32_0 = arith.constant 0 : i32
    %c0_i32_1 = arith.constant 0 : i32
    return %c0_i32, %c0_i32_0 : i32, i32
  }
  func.func @transform_2(%arg0: i32) -> (i32, i32) {
    %c0_i32 = arith.constant 0 : i32
    %c0_i32_0 = arith.constant 0 : i32
    %c0_i32_1 = arith.constant 0 : i32
    return %c0_i32, %c0_i32_0 : i32, i32
  }
  func.func @transform_3(%arg0: i32) -> (i32, i32) {
    %c0_i32 = arith.constant 0 : i32
    %c0_i32_0 = arith.constant 0 : i32
    return %arg0, %c0_i32 : i32, i32
  }
}

module attributes {stable_mosaic.version = 11 : i64} {
  func.func @_patch_embed_kernel(%arg0: i32, %arg1: memref<8x64xbf16, #tpu.memory_space<vmem>>, %arg2: memref<64x128xbf16, #tpu.memory_space<vmem>>, %arg3: memref<8x128xf32, #tpu.memory_space<vmem>>, %arg4: memref<8x128xf32, #tpu.memory_space<vmem>>) attributes {dimension_semantics = [#tpu.dimension_semantics<parallel>], iteration_bounds = array<i64: 1>, scalar_prefetch = 0 : i64, scratch_operands = 0 : i64, tpu.core_type = #tpu.core_type<tc>, window_params = [{transform_indices = @transform_0, window_bounds = array<i64: 8, 64>}, {pipeline_mode = #tpu.pipeline_mode<synchronous>, transform_indices = @transform_1, window_bounds = array<i64: 64, 128>}, {pipeline_mode = #tpu.pipeline_mode<synchronous>, transform_indices = @transform_2, window_bounds = array<i64: 8, 128>}, {transform_indices = @transform_3, window_bounds = array<i64: 8, 128>}]} {
    %c0 = arith.constant 0 : index
    %c0_0 = arith.constant 0 : index
    %0 = vector.load %arg1[%c0, %c0_0] : memref<8x64xbf16, #tpu.memory_space<vmem>>, vector<8x64xbf16>
    %c0_1 = arith.constant 0 : index
    %c0_2 = arith.constant 0 : index
    %1 = vector.load %arg2[%c0_1, %c0_2] : memref<64x128xbf16, #tpu.memory_space<vmem>>, vector<64x128xbf16>
    %cst = arith.constant dense<0.000000e+00> : vector<8x128xf32>
    %2 = tpu.matmul %0, %1, %cst {dimension_numbers = #tpu.dot_dimension_numbers<[1], [0], [0], [1], [0, 0, 1, 1], [], []>} : vector<8x64xbf16>, vector<64x128xbf16>, vector<8x128xf32> -> vector<8x128xf32>
    %c0_3 = arith.constant 0 : index
    %c0_4 = arith.constant 0 : index
    %3 = vector.load %arg3[%c0_3, %c0_4] : memref<8x128xf32, #tpu.memory_space<vmem>>, vector<8x128xf32>
    %4 = arith.addf %2, %3 : vector<8x128xf32>
    %c0_5 = arith.constant 0 : index
    %c0_6 = arith.constant 0 : index
    %5 = vector.load %arg4[%c0_5, %c0_6] : memref<8x128xf32, #tpu.memory_space<vmem>>, vector<8x128xf32>
    tpu.vector_store %arg4[%c0_5, %c0_6], %4 {strides = array<i32>} : memref<8x128xf32, #tpu.memory_space<vmem>>, vector<8x128xf32>,
    return
  }
  func.func @transform_0(%arg0: i32) -> (i32, i32) {
    %c0_i32 = arith.constant 0 : i32
    %c0_i32_0 = arith.constant 0 : i32
    return %arg0, %c0_i32 : i32, i32
  }
  func.func @transform_1(%arg0: i32) -> (i32, i32) {
    %c0_i32 = arith.constant 0 : i32
    %c0_i32_0 = arith.constant 0 : i32
    %c0_i32_1 = arith.constant 0 : i32
    return %c0_i32, %c0_i32_0 : i32, i32
  }
  func.func @transform_2(%arg0: i32) -> (i32, i32) {
    %c0_i32 = arith.constant 0 : i32
    %c0_i32_0 = arith.constant 0 : i32
    %c0_i32_1 = arith.constant 0 : i32
    return %c0_i32, %c0_i32_0 : i32, i32
  }
  func.func @transform_3(%arg0: i32) -> (i32, i32) {
    %c0_i32 = arith.constant 0 : i32
    %c0_i32_0 = arith.constant 0 : i32
    return %arg0, %c0_i32 : i32, i32
  }
}

</mosaic_0001>

<bundles_post_ra>
// kernel: forward.1
= control target key start
LH: loop header
LB: loop body
LE: loop exit
PB: predicated region body
PF: predicated region fallthrough
CT: control target
= control target key end

     0   :  { %vm49_vm0 = vcmask 523264   ;;  %s133_s1 = inlined_call_operand.vmem [shape: bf16[64,128], index: 1, kind: input, shape index: {}]   ;;  %s134_s0 = inlined_call_operand.vmem [shape: bf16[8,64], index: 0, kind: input, shape index: {}]   ;;  %s135_s2 = inlined_call_operand.vmem [shape: f32[8,128], index: 2, kind: input, shape index: {}]   ;;  %s136_s3 = inlined_call_operand.vmem [shape: f32[8,128], index: 3, kind: output, shape index: {}]  }
   0x1   :  { %v91_v0 = vld [vmem:[%s133_s1 + $0x18] sm:$0xff]  ;;  %v90_v1 = vld [vmem:[%s133_s1 + $0x10] sm:$0xff]  ;;  %v89_v2 = vld [vmem:[%s133_s1 + $0x8] sm:$0xff] }
   0x2   :  { %57 = vmatpush.bf16.msra.mxu0 %v91_v0  ;;  %v88_v3 = vld [vmem:[%s133_s1] sm:$0xff] }
   0x3   :  { %v15_v4 = vld [vmem:[%s134_s0] sm:$0xf] }
   0x4   :  { %v24_v5 = vld [vmem:[%s135_s2] sm:$0xff] }
   0x6   :  { %58 = vmatpush.bf16.msra.mxu0 %v90_v1 }
   0xa   :  { %59 = vmatpush.bf16.msra.mxu0 %v89_v2 }
   0xe   :  { %60 = vmatpush.bf16.msra.mxu0 %v88_v3 }
  0x11   :  { %87 = vmatmul.msk.bf16.vlgmr.msra.gmra.mxu0 %vm49_vm0, %v15_v4 }
  0x8e   :  { %v62_v6 = vpop.f32.mrf.mxu0 }
  0x8f   :  { %v63_v7 = vadd.f32 %v62_v6, %v24_v5 }
  0x91   :  { %66 = vst [vmem:[%s136_s3] sm:$0xff] %v63_v7 }
  0x96   :  { %v64_v8 = vpop.f32.mrf.mxu0 }

// kernel: forward.1
= control target key start
LH: loop header
LB: loop body
LE: loop exit
PB: predicated region body
PF: predicated region fallthrough
CT: control target
= control target key end

     0   :  { %vm49_vm0 = vcmask 523264   ;;  %s133_s1 = inlined_call_operand.vmem [shape: bf16[64,128], index: 1, kind: input, shape index: {}]   ;;  %s134_s0 = inlined_call_operand.vmem [shape: bf16[8,64], index: 0, kind: input, shape index: {}]   ;;  %s135_s2 = inlined_call_operand.vmem [shape: f32[8,128], index: 2, kind: input, shape index: {}]   ;;  %s136_s3 = inlined_call_operand.vmem [shape: f32[8,128], index: 3, kind: output, shape index: {}]  }
   0x1   :  { %v91_v0 = vld [vmem:[%s133_s1 + $0x18] sm:$0xff]  ;;  %v90_v1 = vld [vmem:[%s133_s1 + $0x10] sm:$0xff]  ;;  %v89_v2 = vld [vmem:[%s133_s1 + $0x8] sm:$0xff] }
   0x2   :  { %57 = vmatpush.bf16.msra.mxu0 %v91_v0  ;;  %v88_v3 = vld [vmem:[%s133_s1] sm:$0xff] }
   0x3   :  { %v15_v4 = vld [vmem:[%s134_s0] sm:$0xf] }
   0x4   :  { %v24_v5 = vld [vmem:[%s135_s2] sm:$0xff] }
   0x6   :  { %58 = vmatpush.bf16.msra.mxu0 %v90_v1 }
   0xa   :  { %59 = vmatpush.bf16.msra.mxu0 %v89_v2 }
   0xe   :  { %60 = vmatpush.bf16.msra.mxu0 %v88_v3 }
  0x11   :  { %87 = vmatmul.msk.bf16.vlgmr.msra.gmra.mxu0 %vm49_vm0, %v15_v4 }
  0x8e   :  { %v62_v6 = vpop.f32.mrf.mxu0 }
  0x8f   :  { %v63_v7 = vadd.f32 %v62_v6, %v24_v5 }
  0x91   :  { %66 = vst [vmem:[%s136_s3] sm:$0xff] %v63_v7 }
  0x96   :  { %v64_v8 = vpop.f32.mrf.mxu0 }

</bundles_post_ra>
